<compile_context>
chip_gen: v6e
topology: v6e:2x2x1
jax: 0.10.0
libtpu: 0.0.40
codegen_flags: <defaults>
</compile_context>

<pallas_src>
import numpy as np
import jax
import jax.numpy as jnp
from jax.experimental import pallas as pl
from jax.experimental.pallas import tpu as pltpu

KSIZE = 7
PAD = 3


def spatial_block_kernel(x_ref, c_ref, m_ref, ma_ref, mm_ref, bpool_ref,
                         wtrans_ref, btrans_ref, out_ref):
    # x/c/m/out refs: (1, C, HW) VMEM (lane dim = HW, multiple of 128)
    # ma/mm refs:     (HW, HW) VMEM  (7x7 conv as a matrix, per pooled channel)
    # bpool_ref:      (1,) SMEM scalar bias of conv_pool
    # wtrans_ref:     (C, C) VMEM (O, I) weight of the 1x1 conv
    # btrans_ref:     (C, 1) VMEM bias of the 1x1 conv
    s = x_ref[0] + c_ref[0] + m_ref[0]                      # (C, HW)

    inv_c = 1.0 / s.shape[0]
    avg = jnp.sum(s, axis=0, keepdims=True) * inv_c         # (1, HW)
    mx = jnp.max(s, axis=0, keepdims=True)                  # (1, HW)

    # 7x7 conv (2->1 ch, pad=3) as two MXU matmuls against precomputed conv matrices.
    cm = jnp.dot(avg, ma_ref[...], preferred_element_type=jnp.float32)
    cm = cm + jnp.dot(mx, mm_ref[...], preferred_element_type=jnp.float32)
    cm = jax.nn.sigmoid(cm + bpool_ref[0])                  # (1, HW)

    context = cm * s                                        # broadcast over sublanes

    # 1x1 conv (C->C): lane-dense NCHW output; bias folded into the epilogue.
    out_ref[0] = (jnp.dot(wtrans_ref[...], context,
                          preferred_element_type=jnp.float32)
                  + btrans_ref[...])


def _build_conv_matrices(conv_pool_w, H, W):
    """Turn the (1, 2, 7, 7) conv_pool weight into two (H*W, H*W) matrices M such that
    flat_conv_out = avg_flat @ M_avg + max_flat @ M_max reproduces the padded 7x7 conv."""
    HW = H * W
    wpool = np.asarray(conv_pool_w, dtype=np.float32)       # (1, 2, 7, 7)
    h_out, w_out = np.meshgrid(np.arange(H), np.arange(W), indexing="ij")
    p_out_full = h_out * W + w_out
    mats = []
    for ch in range(2):
        M = np.zeros((HW, HW), dtype=np.float32)
        for i in range(KSIZE):
            for j in range(KSIZE):
                h_in = h_out + i - PAD
                w_in = w_out + j - PAD
                valid = (h_in >= 0) & (h_in < H) & (w_in >= 0) & (w_in < W)
                p_in = (h_in * W + w_in)[valid]
                p_out = p_out_full[valid]
                M[p_in, p_out] = wpool[0, ch, i, j]
        mats.append(jnp.asarray(M))
    return mats[0], mats[1]


def spatial_block(x_t, c_t, m_t, params):
    """Inputs/outputs in PyTorch NCHW layout (fusion_types='channel_add')."""
    N, C, H, W = x_t.shape
    HW = H * W

    xs = x_t.reshape(N, C, HW).astype(jnp.float32)
    cs = c_t.reshape(N, C, HW).astype(jnp.float32)
    ms = m_t.reshape(N, C, HW).astype(jnp.float32)

    ma, mm = _build_conv_matrices(params["conv_pool_w"], H, W)      # (HW, HW) x2
    bpool = params["conv_pool_b"].astype(jnp.float32)               # (1,)
    wtrans = params["trans_w"][:, :, 0, 0].astype(jnp.float32)      # (C_out, C_in)
    btrans = params["trans_b"].reshape(C, 1).astype(jnp.float32)    # (C, 1)

    out_flat = pl.pallas_call(
        spatial_block_kernel,
        out_shape=jax.ShapeDtypeStruct((N, C, HW), jnp.float32),
        grid_spec=pltpu.PrefetchScalarGridSpec(
            num_scalar_prefetch=0,
            grid=(N,),
            in_specs=[
                pl.BlockSpec((1, C, HW), lambda n: (n, 0, 0)),
                pl.BlockSpec((1, C, HW), lambda n: (n, 0, 0)),
                pl.BlockSpec((1, C, HW), lambda n: (n, 0, 0)),
                pl.BlockSpec((HW, HW), lambda n: (0, 0)),            # avg conv matrix
                pl.BlockSpec((HW, HW), lambda n: (0, 0)),            # max conv matrix
                pl.BlockSpec(memory_space=pltpu.MemorySpace.SMEM),   # conv_pool bias
                pl.BlockSpec((C, C), lambda n: (0, 0)),              # trans weight
                pl.BlockSpec((C, 1), lambda n: (0, 0)),              # trans bias
            ],
            out_specs=pl.BlockSpec((1, C, HW), lambda n: (n, 0, 0)),
        ),
        compiler_params=pltpu.CompilerParams(dimension_semantics=("parallel",)),
    )(xs, cs, ms, ma, mm, bpool, wtrans, btrans)

    return out_flat.reshape(N, C, H, W)


def spatial_block_reference(x_t, c_t, m_t, params):
    """Pure-JAX reference mirroring the PyTorch forward (NCHW)."""
    s = x_t + c_t + m_t
    avg = jnp.mean(s, axis=1, keepdims=True)
    mx = jnp.max(s, axis=1, keepdims=True)
    am = jnp.concatenate([avg, mx], axis=1)
    cm = jax.lax.conv_general_dilated(
        am, params["conv_pool_w"], window_strides=(1, 1),
        padding=((PAD, PAD), (PAD, PAD)),
        dimension_numbers=("NCHW", "OIHW", "NCHW"))
    cm = cm + params["conv_pool_b"][None, :, None, None]
    cm = jax.nn.sigmoid(cm)
    context = cm * s
    out = jax.lax.conv_general_dilated(
        context, params["trans_w"], window_strides=(1, 1),
        padding="VALID", dimension_numbers=("NCHW", "OIHW", "NCHW"))
    out = out + params["trans_b"][None, :, None, None]
    return out


if __name__ == "__main__":
    # Small shapes consistent with the module: N=2, C=16 (in_channels), H=W=16.
    N, C, H, W = 2, 16, 16, 16

    key = jax.random.PRNGKey(0)
    k = jax.random.split(key, 7)
    x_t = jax.random.normal(k[0], (N, C, H, W), dtype=jnp.float32)
    c_t = jax.random.normal(k[1], (N, C, H, W), dtype=jnp.float32)
    m_t = jax.random.normal(k[2], (N, C, H, W), dtype=jnp.float32)

    params = {
        # conv_pool: Conv2d(2 -> 1, k=7, pad=3)
        "conv_pool_w": 0.05 * jax.random.normal(k[3], (1, 2, KSIZE, KSIZE), jnp.float32),
        "conv_pool_b": 0.1 * jax.random.normal(k[4], (1,), jnp.float32),
        # trans: Conv2d(C -> C, k=1)
        "trans_w": 0.1 * jax.random.normal(k[5], (C, C, 1, 1), jnp.float32),
        "trans_b": 0.1 * jax.random.normal(k[6], (C,), jnp.float32),
    }

    out = spatial_block(x_t, c_t, m_t, params)
    out = jax.block_until_ready(out)

    ref = spatial_block_reference(x_t, c_t, m_t, params)
    assert out.shape == (N, C, H, W)
    assert jnp.allclose(out, ref, rtol=1e-4, atol=1e-4), float(jnp.max(jnp.abs(out - ref)))

    print("KERNEL_OK")
</pallas_src>

<mosaic_0001>
module attributes {stable_mosaic.version = 11 : i64} {
  func.func @spatial_block_kernel(%arg0: i32, %arg1: memref<1x16x256xf32, #tpu.memory_space<vmem>>, %arg2: memref<1x16x256xf32, #tpu.memory_space<vmem>>, %arg3: memref<1x16x256xf32, #tpu.memory_space<vmem>>, %arg4: memref<256x256xf32, #tpu.memory_space<vmem>>, %arg5: memref<256x256xf32, #tpu.memory_space<vmem>>, %arg6: memref<1xf32, #tpu.memory_space<smem>>, %arg7: memref<16x16xf32, #tpu.memory_space<vmem>>, %arg8: memref<16x1xf32, #tpu.memory_space<vmem>>, %arg9: memref<1x16x256xf32, #tpu.memory_space<vmem>>) attributes {dimension_semantics = [#tpu.dimension_semantics<parallel>], iteration_bounds = array<i64: 2>, scalar_prefetch = 0 : i64, scratch_operands = 0 : i64, tpu.core_type = #tpu.core_type<tc>, window_params = [{transform_indices = @transform_0, window_bounds = array<i64: 1, 16, 256>}, {transform_indices = @transform_1, window_bounds = array<i64: 1, 16, 256>}, {transform_indices = @transform_2, window_bounds = array<i64: 1, 16, 256>}, {pipeline_mode = #tpu.pipeline_mode<synchronous>, transform_indices = @transform_3, window_bounds = array<i64: 256, 256>}, {pipeline_mode = #tpu.pipeline_mode<synchronous>, transform_indices = @transform_4, window_bounds = array<i64: 256, 256>}, {transform_indices = @transform_5, window_bounds = array<i64: 1>}, {pipeline_mode = #tpu.pipeline_mode<synchronous>, transform_indices = @transform_6, window_bounds = array<i64: 16, 16>}, {pipeline_mode = #tpu.pipeline_mode<synchronous>, transform_indices = @transform_7, window_bounds = array<i64: 16, 1>}, {transform_indices = @transform_8, window_bounds = array<i64: 1, 16, 256>}]} {
    %c0 = arith.constant 0 : index
    %c0_0 = arith.constant 0 : index
    %c0_1 = arith.constant 0 : index
    %0 = vector.load %arg1[%c0, %c0_0, %c0_1] : memref<1x16x256xf32, #tpu.memory_space<vmem>>, vector<1x16x256xf32>
    %1 = vector.shape_cast %0 : vector<1x16x256xf32> to vector<16x256xf32>
    %c0_2 = arith.constant 0 : index
    %c0_3 = arith.constant 0 : index
    %c0_4 = arith.constant 0 : index
    %2 = vector.load %arg2[%c0_2, %c0_3, %c0_4] : memref<1x16x256xf32, #tpu.memory_space<vmem>>, vector<1x16x256xf32>
    %3 = vector.shape_cast %2 : vector<1x16x256xf32> to vector<16x256xf32>
    %4 = arith.addf %1, %3 : vector<16x256xf32>
    %c0_5 = arith.constant 0 : index
    %c0_6 = arith.constant 0 : index
    %c0_7 = arith.constant 0 : index
    %5 = vector.load %arg3[%c0_5, %c0_6, %c0_7] : memref<1x16x256xf32, #tpu.memory_space<vmem>>, vector<1x16x256xf32>
    %6 = vector.shape_cast %5 : vector<1x16x256xf32> to vector<16x256xf32>
    %7 = arith.addf %4, %6 : vector<16x256xf32>
    %cst = arith.constant dense<0.000000e+00> : vector<256xf32>
    %8 = vector.multi_reduction <add>, %7, %cst [0] : vector<16x256xf32> to vector<256xf32>
    %9 = vector.shape_cast %8 : vector<256xf32> to vector<1x256xf32>
    %cst_8 = arith.constant 6.250000e-02 : f32
    %10 = vector.broadcast %cst_8 : f32 to vector<1x256xf32>
    %11 = arith.mulf %9, %10 : vector<1x256xf32>
    %cst_9 = arith.constant dense<0xFF800000> : vector<256xf32>
    %12 = vector.multi_reduction <maximumf>, %7, %cst_9 [0] : vector<16x256xf32> to vector<256xf32>
    %13 = vector.shape_cast %12 : vector<256xf32> to vector<1x256xf32>
    %c0_10 = arith.constant 0 : index
    %c0_11 = arith.constant 0 : index
    %14 = vector.load %arg4[%c0_10, %c0_11] : memref<256x256xf32, #tpu.memory_space<vmem>>, vector<256x256xf32>
    %cst_12 = arith.constant dense<0.000000e+00> : vector<1x256xf32>
    %15 = tpu.matmul %11, %14, %cst_12 {dimension_numbers = #tpu.dot_dimension_numbers<[1], [0], [0], [1], [0, 0, 1, 1], [], []>} : vector<1x256xf32>, vector<256x256xf32>, vector<1x256xf32> -> vector<1x256xf32>
    %c0_13 = arith.constant 0 : index
    %c0_14 = arith.constant 0 : index
    %16 = vector.load %arg5[%c0_13, %c0_14] : memref<256x256xf32, #tpu.memory_space<vmem>>, vector<256x256xf32>
    %cst_15 = arith.constant dense<0.000000e+00> : vector<1x256xf32>
    %17 = tpu.matmul %13, %16, %cst_15 {dimension_numbers = #tpu.dot_dimension_numbers<[1], [0], [0], [1], [0, 0, 1, 1], [], []>} : vector<1x256xf32>, vector<256x256xf32>, vector<1x256xf32> -> vector<1x256xf32>
    %18 = arith.addf %15, %17 : vector<1x256xf32>
    %c0_16 = arith.constant 0 : index
    %19 = memref.load %arg6[%c0_16] : memref<1xf32, #tpu.memory_space<smem>>
    %20 = vector.broadcast %19 : f32 to vector<1x256xf32>
    %21 = arith.addf %18, %20 : vector<1x256xf32>
    %22 = arith.negf %21 : vector<1x256xf32>
    %23 = math.exp %22 : vector<1x256xf32>
    %cst_17 = arith.constant 1.000000e+00 : f32
    %24 = vector.broadcast %cst_17 : f32 to vector<1x256xf32>
    %25 = arith.addf %24, %23 : vector<1x256xf32>
    %26 = arith.divf %24, %25 : vector<1x256xf32>
    %27 = vector.broadcast %26 : vector<1x256xf32> to vector<16x256xf32>
    %28 = arith.mulf %27, %7 : vector<16x256xf32>
    %c0_18 = arith.constant 0 : index
    %c0_19 = arith.constant 0 : index
    %29 = vector.load %arg7[%c0_18, %c0_19] : memref<16x16xf32, #tpu.memory_space<vmem>>, vector<16x16xf32>
    %cst_20 = arith.constant dense<0.000000e+00> : vector<16x256xf32>
    %30 = tpu.matmul %29, %28, %cst_20 {dimension_numbers = #tpu.dot_dimension_numbers<[1], [0], [0], [1], [0, 0, 1, 1], [], []>} : vector<16x16xf32>, vector<16x256xf32>, vector<16x256xf32> -> vector<16x256xf32>
    %c0_21 = arith.constant 0 : index
    %c0_22 = arith.constant 0 : index
    %31 = vector.load %arg8[%c0_21, %c0_22] : memref<16x1xf32, #tpu.memory_space<vmem>>, vector<16x1xf32>
    %32 = vector.broadcast %31 : vector<16x1xf32> to vector<16x256xf32>
    %33 = arith.addf %30, %32 : vector<16x256xf32>
    %c0_23 = arith.constant 0 : index
    %c0_24 = arith.constant 0 : index
    %c0_25 = arith.constant 0 : index
    %34 = vector.load %arg9[%c0_23, %c0_24, %c0_25] : memref<1x16x256xf32, #tpu.memory_space<vmem>>, vector<1x16x256xf32>
    %35 = vector.shape_cast %34 : vector<1x16x256xf32> to vector<16x256xf32>
    %36 = vector.shape_cast %33 : vector<16x256xf32> to vector<1x16x256xf32>
    tpu.vector_store %arg9[%c0_23, %c0_24, %c0_25], %36 {strides = array<i32>} : memref<1x16x256xf32, #tpu.memory_space<vmem>>, vector<1x16x256xf32>,
    return
  }
  func.func @transform_0(%arg0: i32) -> (i32, i32, i32) {
    %c0_i32 = arith.constant 0 : i32
    %c0_i32_0 = arith.constant 0 : i32
    %c0_i32_1 = arith.constant 0 : i32
    return %arg0, %c0_i32, %c0_i32_0 : i32, i32, i32
  }
  func.func @transform_1(%arg0: i32) -> (i32, i32, i32) {
    %c0_i32 = arith.constant 0 : i32
    %c0_i32_0 = arith.constant 0 : i32
    %c0_i32_1 = arith.constant 0 : i32
    return %arg0, %c0_i32, %c0_i32_0 : i32, i32, i32
  }
  func.func @transform_2(%arg0: i32) -> (i32, i32, i32) {
    %c0_i32 = arith.constant 0 : i32
    %c0_i32_0 = arith.constant 0 : i32
    %c0_i32_1 = arith.constant 0 : i32
    return %arg0, %c0_i32, %c0_i32_0 : i32, i32, i32
  }
  func.func @transform_3(%arg0: i32) -> (i32, i32) {
    %c0_i32 = arith.constant 0 : i32
    %c0_i32_0 = arith.constant 0 : i32
    %c0_i32_1 = arith.constant 0 : i32
    return %c0_i32, %c0_i32_0 : i32, i32
  }
  func.func @transform_4(%arg0: i32) -> (i32, i32) {
    %c0_i32 = arith.constant 0 : i32
    %c0_i32_0 = arith.constant 0 : i32
    %c0_i32_1 = arith.constant 0 : i32
    return %c0_i32, %c0_i32_0 : i32, i32
  }
  func.func @transform_5(%arg0: i32) -> i32 {
    %c0_i32 = arith.constant 0 : i32
    %c0_i32_0 = arith.constant 0 : i32
    return %c0_i32 : i32
  }
  func.func @transform_6(%arg0: i32) -> (i32, i32) {
    %c0_i32 = arith.constant 0 : i32
    %c0_i32_0 = arith.constant 0 : i32
    %c0_i32_1 = arith.constant 0 : i32
    return %c0_i32, %c0_i32_0 : i32, i32
  }
  func.func @transform_7(%arg0: i32) -> (i32, i32) {
    %c0_i32 = arith.constant 0 : i32
    %c0_i32_0 = arith.constant 0 : i32
    %c0_i32_1 = arith.constant 0 : i32
    return %c0_i32, %c0_i32_0 : i32, i32
  }
  func.func @transform_8(%arg0: i32) -> (i32, i32, i32) {
    %c0_i32 = arith.constant 0 : i32
    %c0_i32_0 = arith.constant 0 : i32
    %c0_i32_1 = arith.constant 0 : i32
    return %arg0, %c0_i32, %c0_i32_0 : i32, i32, i32
  }
}

</mosaic_0001>

<bundles_post_ra>
// kernel: tpu_custom_call.1
= control target key start
LH: loop header
LB: loop body
LE: loop exit
PB: predicated region body
PF: predicated region fallthrough
CT: control target
= control target key end

     0   :  { %s1772_s0 = inlined_call_operand.hbm [shape: f32[2,16,256], index: 0, kind: input, shape index: {}]   ;;  %s1773_s1 = inlined_call_operand.hbm [shape: f32[2,16,256], index: 1, kind: input, shape index: {}]   ;;  %s1774_s2 = inlined_call_operand.hbm [shape: f32[2,16,256], index: 2, kind: input, shape index: {}]   ;;  %s1775_s3 = inlined_call_operand.hbm [shape: f32[256,256], index: 3, kind: input, shape index: {}]   ;;  %s1776_s4 = inlined_call_operand.hbm [shape: f32[256,256], index: 4, kind: input, shape index: {}]   ;;  %s1777_s5 = inlined_call_operand.<no memory space> [shape: f32[1], index: 5, kind: input, shape index: {}]   ;;  %s1778_s6 = inlined_call_operand.vmem [shape: f32[16,16], index: 6, kind: input, shape index: {}]   ;;  %s1779_s7 = inlined_call_operand.vmem [shape: f32[16,1], index: 7, kind: input, shape index: {}]   ;;  %s1780_s8 = inlined_call_operand.hbm [shape: f32[2,16,256], index: 8, kind: output, shape index: {}]  }
   0x1   :  { %1796 = sst [smem:[#allocation20_spill]] %s1773_s1 }
   0x2   :  { %1797 = sst [smem:[#allocation21_spill]] %s1775_s3 }
   0x3   :  { %1798 = sst [smem:[#allocation22_spill]] %s1776_s4 }
   0x4   :  { %13 = sst [smem:[#allocation2]] %s1777_s5 }
   0x5   :  { %14 = vsyncpa [#allocation4], 0 }
   0x6   :  { %16 = vsyncpa [#allocation4 + $0x1], 0 }
   0x7   :  { %17 = vsyncpa [#allocation7], 0 }
   0x8   :  { %19 = vsyncpa [#allocation7 + $0x1], 0 }
   0x9   :  { %20 = vsyncpa [#allocation10], 0 }
   0xa   :  { %21 = vsyncpa [#allocation5], 0 }
   0xb   :  { %23 = vsyncpa [#allocation5 + $0x1], 0  ;;  %s1430_s29 = smov 0   ;;  %s1432_s30 = smov 0  }
   0xc   :  { %s1434_s9 = smov 0   ;;  %s1436_s10 = smov 0  }
   0xd LB: > { %1799 = sst [smem:[#allocation17_spill]] %s1368_s10  ;;  %s1451_s5 = sadd.s32 4294967295, %s1368_s10   ;;  %s1368_s10 = sphi %s1436_s10, %s1826_s10   ;;  %s1364_s9 = sphi %s1434_s9, %s1830_s9   ;;  %s1360_s30 = sphi %s1432_s30, %s1829_s30   ;;  %s1356_s29 = sphi %s1430_s29, %s1828_s29  }
   0xe   : > { %s1030_s11 = sadd.s32 4294967294, %s1368_s10   ;;  %s1455_s12 = sadd.s32 1, %s1368_s10  }
   0xf   : > { %1800 = sst [smem:[#allocation18_spill]] %s1455_s12  ;;  %s36_s13 = sadd.s32 1, %s1364_s9 }
  0x10   : > { %s33_s14 = ssub.s32 %s1368_s10, %s1455_s12  ;;  %p43_p0 = scmp.ne.s32.totalorder %s1364_s9, %s1360_s30 }
  0x11   : > { %p34_p1 = scmp.eq.s32.totalorder %s33_s14, 0  ;;  %p44_p2 = scmp.eq.s32.totalorder %s1368_s10, 0 }
  0x12   : > { %p49_p3 = scmp.ne.s32.totalorder %s1360_s30, %s1356_s29  ;;  %p1781_p4 = scmp.eq.s32.totalorder %s1451_s5, 0 }
  0x13   : > { %s1467_s15 = scalar_select %p34_p1, %s1364_s9, %s36_s13  }
  0x14   : > { %p1469_p5 = por %p44_p2, %p43_p0  ;;  %p1475_p6 = por %p1781_p4, %p49_p3 }
  0x15   : > { %1801 = sst [smem:[#allocation19_spill]] %s1467_s15  ;;  %p230_p7 = scmp.eq.s32.totalorder %s1451_s5, 1 }
  0x16   : > { %s1803_s17 = scalar_select %p1475_p6, 1, 0 }
  0x17   : > { %p236_p8 = scmp.eq.s32.totalorder %s1030_s11, 1  ;;  %p1031_p9 = scmp.ge.s32.totalorder %s1368_s10, 1 }
  0x18   : > { %p243_p10 = scmp.lt.s32.totalorder %s1368_s10, 3  ;;  %p1482_p11 = por %p230_p7, %p43_p0 }
  0x19   : > { %p1486_p12 = por %p236_p8, %p49_p3  ;;  %s1370_s21 = smov [#allocation9]  }
  0x1a   : > { %s1804_s18 = scalar_select %p1482_p11, 1, 0 }
  0x1b   : > { %s1805_s19 = scalar_select %p1486_p12, 1, 0 }
  0x1c   : > { %p1490_p13 = pnand %p1031_p9, %p243_p10  ;;  %s255_s22 = sshll.u32 %s1370_s21, 4  ;;  %s256_s22 = int_to_ptr.vmem [resolvable:$true] %s255_s22 }
  0x1d   : > { %p1107_p3 = scmp.lt.s32.totalorder %s1368_s10, 2  ;;  %s1783_s24 = sand.u32 1, %s1364_s9  }
  0x1e   : > { %s1806_s20 = scalar_select %p1490_p13, 1, 0 }
  0x1f   : > { %p1084_p1 = pneg %p1490_p13  ;;  %s1507_s25 = sshll.u32 %s1783_s24, 5 }
  0x20   : > { %s1171_s26 = scalar_lea.vmem %s256_s22, 8192 }
  0x21   : > { %p1498_p2 = pnand %p1084_p1, %p1781_p4  ;;  %p1172_p8 = scmp.ne.s32.totalorder %s256_s22, %s1171_s26 }
  0x22   : > { %p1179_p1 = scmp.lt.s32.totalorder %s256_s22, %s256_s22  ;;  %p1180_p4 = scmp.lt.s32.totalorder %s1171_s26, %s1171_s26 }
  0x23   : > { %s1807_s23 = scalar_select %p1498_p2, 1, 0 }
  0x24   : > { %p1791_p7 = pneg %p1498_p2  ;;  %p1181_p12 = por %p1180_p4, %p1179_p1 }
  0x26   : > { %p1174_p9 = pnand %p1172_p8, %p1791_p7 }
  0x28   : > { %p1175_p10 = pneg %p1174_p9 }
  0x2a   : > { %p1182_p11 = pnand %p1181_p12, %p1175_p10 }
  0x2c   : > { %1185 = shalt.err (!%p1182_p11)
}
  0x2d   : > { %s1786_s27 = smov 256   ;;  %s1788_s28 = smov 16  }
  0x2e   : > { %s1808_s3 = sld [smem:[#allocation21_spill]]  ;;  %s1523_s14 = sshll.u32 %s1368_s10, 9 }
  0x2f   : > { %p1529_p4 = pnand %p1107_p3, %p1469_p5  ;;  %s312_s26 = sand.u32 1, %s1368_s10  }
  0x30   : > { %s1810_s1 = sld [smem:[#allocation20_spill]]  ;;  %s1543_s16 = scalar_lea.sflag [#allocation7], %s312_s26 }
  0x31   : > { %p1549_p11 = pneg %p1529_p4 }
  0x34   : > { %1087 = dma.hbm_to_vmem [thread:$0]  (!%p1498_p2), %s1808_s3, 8192, %s256_s22, [#allocation10], %s1786_s27, %s1786_s27, %s1788_s28  }
  0x35   : > { %s316_s22 = scalar_lea.vmem [#allocation6], %s1507_s25 }
  0x36   : > { %s1538_s12 = scalar_lea.hbm %s1810_s1, %s1523_s14  ;;  %s323_s11 = sshll.u32 %s316_s22, 4  ;;  %s1541_s11 = int_to_ptr.vmem [resolvable:$true] %s323_s11 }
  0x37   : > { %s1186_s13 = scalar_lea.hbm %s1538_s12, 512  ;;  %s1191_s28 = scalar_lea.hbm %s1810_s1, 1024 }
  0x38   : > { %p1187_p5 = scmp.ne.s32.totalorder %s1538_s12, %s1186_s13  ;;  %p1192_p8 = scmp.lt.s32.totalorder %s1538_s12, %s1810_s1 }
  0x39   : > { %p1193_p9 = scmp.lt.s32.totalorder %s1191_s28, %s1186_s13 }
  0x3a   : > { %p1189_p12 = pnand %p1549_p11, %p1187_p5 }
  0x3b   : > { %p1194_p10 = por %p1193_p9, %p1192_p8 }
  0x3c   : > { %p1190_p3 = pneg %p1189_p12 }
  0x3e   : > { %p1195_p1 = pnand %p1194_p10, %p1190_p3 }
  0x40   : > { %1198 = shalt.err (!%p1195_p1)
}
  0x41   : > { %s1199_s26 = scalar_lea.vmem %s1541_s11, 512  ;;  %s1373_s10 = smov [#allocation6]  }
  0x42   : > { %p1200_p0 = scmp.ne.s32.totalorder %s1541_s11, %s1199_s26  ;;  %s1204_s15 = sshll.u32 %s1373_s10, 4  ;;  %s1205_s15 = int_to_ptr.vmem [resolvable:$false] %s1204_s15 }
  0x43   : > { %s1206_s24 = scalar_lea.vmem %s1205_s15, 1024  ;;  %p1207_p7 = scmp.lt.s32.totalorder %s1541_s11, %s1205_s15 }
  0x44   : > { %p1202_p5 = pnand %p1200_p0, %p1549_p11  ;;  %p1208_p6 = scmp.lt.s32.totalorder %s1206_s24, %s1199_s26 }
  0x46   : > { %p1203_p12 = pneg %p1202_p5  ;;  %p1209_p13 = por %p1208_p6, %p1207_p7 }
  0x48   : > { %p1210_p2 = pnand %p1209_p13, %p1203_p12 }
  0x4a   : > { %1213 = shalt.err (!%p1210_p2)
}
  0x4b   : > { %s1812_s3 = smov 16   ;;  %s1813_s28 = smov 256  }
  0x4c   : > { %1097 = dma.hbm_to_vmem [thread:$0]  (!%p1529_p4), %s1538_s12, 512, %s1541_s11, %s1543_s16, %s1813_s28, %s1813_s28, %s1812_s3  }
  0x4d   : > { %s1374_s13 = smov [#allocation11]   ;;  %p1814_p3 = scmp.ne.s32.totalorder %s1807_s23, 0 }
  0x4e   : > { %s268_s22 = sshll.u32 %s1374_s13, 4  ;;  %s269_s22 = int_to_ptr.vmem [resolvable:$true] %s268_s22 }
  0x4f   : > { %s1225_s10 = scalar_lea.vmem %s269_s22, 8192  ;;  %p1815_p8 = pneg %p1814_p3 }
  0x50   : > { %p1226_p0 = scmp.ne.s32.totalorder %s269_s22, %s1225_s10  ;;  %p1233_p2 = scmp.lt.s32.totalorder %s269_s22, %s269_s22 }
  0x51   : > { %p1234_p7 = scmp.lt.s32.totalorder %s1225_s10, %s1225_s10 }
  0x52   : > { %p1228_p6 = pnand %p1226_p0, %p1815_p8 }
  0x53   : > { %p1235_p9 = por %p1234_p7, %p1233_p2 }
  0x54   : > { %p1229_p13 = pneg %p1228_p6 }
  0x56   : > { %p1236_p10 = pnand %p1235_p9, %p1229_p13 }
  0x58   : > { %1239 = shalt.err (!%p1236_p10)
}
  0x59   : > { %s1816_s4 = sld [smem:[#allocation22_spill]]  ;;  %s1590_s24 = scalar_lea.hbm %s1772_s0, %s1523_s14 }
  0x5a   : > { %s295_s23 = scalar_lea.vmem [#allocation3], %s1507_s25  ;;  %s1817_s10 = sand.u32 1, %s1364_s9  }
  0x5b   : > { %s302_s13 = sshll.u32 %s295_s23, 4  ;;  %s292_s1 = scalar_lea.sflag [#allocation4], %s1817_s10  ;;  %s1593_s13 = int_to_ptr.vmem [resolvable:$true] %s302_s13 }
  0x5c   : > { %s1240_s12 = scalar_lea.hbm %s1590_s24, 512  ;;  %s1245_s26 = scalar_lea.hbm %s1772_s0, 1024 }
  0x5d   : > { %p1241_p1 = scmp.ne.s32.totalorder %s1590_s24, %s1240_s12  ;;  %p1246_p0 = scmp.lt.s32.totalorder %s1590_s24, %s1772_s0 }
  0x5f   : > { %1090 = dma.hbm_to_vmem [thread:$0]  (!%p1814_p3), %s1816_s4, 8192, %s269_s22, [#allocation10], %s1813_s28, %s1813_s28, %s1812_s3  }
  0x60   : > { %p1243_p5 = pnand %p1241_p1, %p1549_p11  ;;  %p1247_p3 = scmp.lt.s32.totalorder %s1245_s26, %s1240_s12 }
  0x62   : > { %p1244_p12 = pneg %p1243_p5  ;;  %p1248_p8 = por %p1247_p3, %p1246_p0 }
  0x64   : > { %p1249_p6 = pnand %p1248_p8, %p1244_p12 }
  0x66   : > { %1252 = shalt.err (!%p1249_p6)
}
  0x67   : > { %s1253_s23 = scalar_lea.vmem %s1593_s13, 512  ;;  %s1375_s10 = smov [#allocation3]  }
  0x68   : > { %p1254_p13 = scmp.ne.s32.totalorder %s1593_s13, %s1253_s23  ;;  %s1258_s22 = sshll.u32 %s1375_s10, 4  ;;  %s1259_s22 = int_to_ptr.vmem [resolvable:$false] %s1258_s22 }
  0x69   : > { %s1260_s11 = scalar_lea.vmem %s1259_s22, 1024  ;;  %p1261_p9 = scmp.lt.s32.totalorder %s1593_s13, %s1259_s22 }
  0x6a   : > { %p1256_p2 = pnand %p1254_p13, %p1549_p11  ;;  %p1262_p10 = scmp.lt.s32.totalorder %s1260_s11, %s1253_s23 }
  0x6c   : > { %p1257_p7 = pneg %p1256_p2  ;;  %p1263_p1 = por %p1262_p10, %p1261_p9 }
  0x6e   : > { %p1264_p5 = pnand %p1263_p1, %p1257_p7 }
  0x70   : > { %1267 = shalt.err (!%p1264_p5)
}
  0x71   : > { %1094 = dma.hbm_to_vmem [thread:$0]  (!%p1529_p4), %s1590_s24, 512, %s1593_s13, %s292_s1, %s1813_s28, %s1813_s28, %s1812_s3  }
  0x72   : > { %s1624_s26 = scalar_lea.hbm %s1774_s2, %s1523_s14  ;;  %s337_s15 = scalar_lea.vmem [#allocation8], %s1507_s25 }
  0x73   : > { %s344_s23 = sshll.u32 %s337_s15, 4  ;;  %s1268_s10 = scalar_lea.hbm %s1624_s26, 512  ;;  %s345_s23 = int_to_ptr.vmem [resolvable:$true] %s344_s23 }
  0x74   : > { %p1269_p12 = scmp.ne.s32.totalorder %s1624_s26, %s1268_s10  ;;  %s1273_s1 = scalar_lea.hbm %s1774_s2, 1024 }
  0x75   : > { %p1274_p8 = scmp.lt.s32.totalorder %s1624_s26, %s1774_s2  ;;  %p1275_p6 = scmp.lt.s32.totalorder %s1273_s1, %s1268_s10 }
  0x76   : > { %p1271_p0 = pnand %p1269_p12, %p1549_p11 }
  0x77   : > { %p1276_p13 = por %p1275_p6, %p1274_p8 }
  0x78   : > { %p1272_p3 = pneg %p1271_p0 }
  0x7a   : > { %p1277_p2 = pnand %p1276_p13, %p1272_p3 }
  0x7c   : > { %1280 = shalt.err (!%p1277_p2)
}
  0x7d   : > { %s1281_s25 = scalar_lea.vmem %s345_s23, 512  ;;  %s1376_s14 = smov [#allocation8]  }
  0x7e   : > { %p1282_p7 = scmp.ne.s32.totalorder %s345_s23, %s1281_s25  ;;  %s1286_s4 = sshll.u32 %s1376_s14, 4  ;;  %s1287_s4 = int_to_ptr.vmem [resolvable:$false] %s1286_s4 }
  0x7f   : > { %s1288_s12 = scalar_lea.vmem %s1287_s4, 1024  ;;  %p1289_p1 = scmp.lt.s32.totalorder %s345_s23, %s1287_s4 }
  0x80   : > { %p1284_p9 = pnand %p1282_p7, %p1549_p11  ;;  %p1290_p5 = scmp.lt.s32.totalorder %s1288_s12, %s1281_s25 }
  0x82   : > { %p1285_p10 = pneg %p1284_p9  ;;  %p1291_p12 = por %p1290_p5, %p1289_p1 }
  0x84   : > { %p1292_p0 = pnand %p1291_p12, %p1285_p10 }
  0x86   : > { %1295 = shalt.err (!%p1292_p0)
}
  0x87   : > { %1100 = dma.hbm_to_vmem [thread:$0]  (!%p1529_p4), %s1624_s26, 512, %s345_s23, %s1543_s16, %s1813_s28, %s1813_s28, %s1812_s3  }
  0x88   : > { %p1818_p11 = scmp.ne.s32.totalorder %s1806_s20, 0 }
  0x89   : > { %s1650_s27 = sand.u32 (!%p1818_p11), 1, %s1360_s30   ;;  %p1819_p3 = scmp.ne.s32.totalorder (!%p1818_p11), %s1803_s17, 0 }
  0x8a   : > { %356 = sbr.rel (%p1818_p11) target bundleno = 667 (0x29b), region = 52  ;;  %s1653_s15 = sshll.u32 (!%p1818_p11), %s1650_s27, 5 }
  0x8b   : > { %s359_s10 = scalar_lea.sflag (!%p1818_p11), [#allocation4], %s1650_s27  ;;  %s1657_s21 = scalar_lea.vmem (!%p1818_p11), [#allocation3], %s1653_s15 }
  0x8f   : > { %1339 = dma.done.wait (%p1819_p3), %s359_s10, 512  }
  0x90   : > { %1341 = vsyncadd (%p1819_p3), %s359_s10, 4294966784  ;;  %s367_s20 = sand.u32 1, %s1451_s5   ;;  %s1665_s3 = scalar_lea.vmem [#allocation6], %s1653_s15 }
  0x91   : > { %s368_s16 = scalar_lea.sflag [#allocation7], %s367_s20 }
  0x92   : > { %1343 = dma.done.wait (%p1819_p3), %s368_s16, 1024  }
  0x93   : > { %1345 = vsyncadd (%p1819_p3), %s368_s16, 4294966272  ;;  %s1672_s28 = scalar_lea.vmem [#allocation8], %s1653_s15  ;;  %p1820_p4 = scmp.eq.s32.totalorder %s1451_s5, 0 }
  0x95   : > { %1347 = dma.done.wait (%p1820_p4), [#allocation10], 16384   ;;  %p1821_p8 = pmov %p1820_p4 }
  0x96   : > { %v576_v0 = vld [vmem:[#allocation11 + $0xf8] sm:$0xff]  ;;  %v575_v2 = vld [vmem:[#allocation11 + $0xf0] sm:$0xff]  ;;  %v574_v4 = vld [vmem:[#allocation11 + $0xe8] sm:$0xff]  ;;  %s751_s11 = sld [smem:[#allocation2]]  ;;  %vm793_vm0 = vcmask 130048   ;;  %s430_s14 = scalar_lea.vmem [#allocation12], %s1653_s15 }
  0x97   : > { %1349 = vsyncadd (%p1821_p8), [#allocation10], 4294950912  ;;  %v512_v1 = vld [vmem:[#allocation9 + $0xf8] sm:$0xff]  ;;  %609 = vmatprep.subr.mxu0 %v576_v0  ;;  %v511_v3 = vld [vmem:[#allocation9 + $0xf0] sm:$0xff]  ;;  %s895_s4 = sshll.u32 %s430_s14, 4  ;;  %s1063_s12 = sshll.u32 %s1451_s5, 9  ;;  %s1724_s4 = int_to_ptr.vmem [resolvable:$true] %s895_s4 }
  0x98   : > { %680 = vmatprep.subr.mxu1 %v512_v1  ;;  %v510_v5 = vld [vmem:[#allocation9 + $0xe8] sm:$0xff]  ;;  %610 = vmatpush1.msra.mxu0 %v575_v2  ;;  %v573_v6 = vld [vmem:[#allocation11 + $0xe0] sm:$0xff]  ;;  %v572_v8 = vld [vmem:[#allocation11 + $0xd8] sm:$0xff]  ;;  %s1729_s20 = scalar_lea.hbm %s1780_s8, %s1063_s12  ;;  %s882_s5 = scalar_lea.sflag [#allocation5], %s1650_s27 }
  0x99   : > { %681 = vmatpush1.msra.mxu1 %v511_v3  ;;  %v509_v7 = vld [vmem:[#allocation9 + $0xe0] sm:$0xff]  ;;  %611 = vmatprep.subr.mxu0 %v574_v4  ;;  %v508_v9 = vld [vmem:[#allocation9 + $0xd8] sm:$0xff]  ;;  %v571_v10 = vld [vmem:[#allocation11 + $0xd0] sm:$0xff]  ;;  %s1296_s15 = scalar_lea.vmem %s1724_s4, 512  ;;  %p1822_p13 = scmp.ne.s32.totalorder %s1804_s18, 0 }
  0x9a   : > { %682 = vmatprep.subr.mxu1 %v510_v5  ;;  %v507_v11 = vld [vmem:[#allocation9 + $0xd0] sm:$0xff]  ;;  %612 = vmatpush1.msra.mxu0 %v573_v6  ;;  %v570_v12 = vld [vmem:[#allocation11 + $0xc8] sm:$0xff]  ;;  %v569_v14 = vld [vmem:[#allocation11 + $0xc0] sm:$0xff]  ;;  %p1297_p6 = scmp.ne.s32.totalorder %s1724_s4, %s1296_s15  ;;  %s1379_s16 = smov [#allocation12]  }
  0x9b   : > { %683 = vmatpush1.msra.mxu1 %v509_v7  ;;  %v506_v13 = vld [vmem:[#allocation9 + $0xc8] sm:$0xff]  ;;  %613 = vmatprep.subr.mxu0 %v572_v8  ;;  %v505_v15 = vld [vmem:[#allocation9 + $0xc0] sm:$0xff]  ;;  %v568_v16 = vld [vmem:[#allocation11 + $0xb8] sm:$0xff] }
  0x9c   : > { %684 = vmatprep.subr.mxu1 %v508_v9  ;;  %614 = vmatpush1.msra.mxu0 %v571_v10  ;;  %v504_v17 = vld [vmem:[#allocation9 + $0xb8] sm:$0xff]  ;;  %v567_v18 = vld [vmem:[#allocation11 + $0xb0] sm:$0xff]  ;;  %v566_v20 = vld [vmem:[#allocation11 + $0xa8] sm:$0xff]  ;;  %p1298_p2 = pnand %p1297_p6, %p1822_p13 }
  0x9d   : > { %685 = vmatpush1.msra.mxu1 %v507_v11  ;;  %615 = vmatprep.subr.mxu0 %v570_v12  ;;  %v503_v19 = vld [vmem:[#allocation9 + $0xb0] sm:$0xff]  ;;  %v502_v21 = vld [vmem:[#allocation9 + $0xa8] sm:$0xff]  ;;  %v565_v22 = vld [vmem:[#allocation11 + $0xa0] sm:$0xff] }
  0x9e   : > { %686 = vmatprep.subr.mxu1 %v506_v13  ;;  %616 = vmatpush1.msra.mxu0 %v569_v14  ;;  %v501_v23 = vld [vmem:[#allocation9 + $0xa0] sm:$0xff]  ;;  %v564_v24 = vld [vmem:[#allocation11 + $0x98] sm:$0xff]  ;;  %v563_v26 = vld [vmem:[#allocation11 + $0x90] sm:$0xff]  ;;  %p1299_p7 = pneg %p1298_p2 }
  0x9f   : > { %687 = vmatpush1.msra.mxu1 %v505_v15  ;;  %617 = vmatprep.subr.mxu0 %v568_v16  ;;  %v500_v25 = vld [vmem:[#allocation9 + $0x98] sm:$0xff]  ;;  %v499_v27 = vld [vmem:[#allocation9 + $0x90] sm:$0xff]  ;;  %v562_v28 = vld [vmem:[#allocation11 + $0x88] sm:$0xff] }
  0xa0   : > { %688 = vmatprep.subr.mxu1 %v504_v17  ;;  %618 = vmatpush1.msra.mxu0 %v567_v18  ;;  %v498_v29 = vld [vmem:[#allocation9 + $0x88] sm:$0xff]  ;;  %v561_v30 = vld [vmem:[#allocation11 + $0x80] sm:$0xff]  ;;  %v560_v32 = vld [vmem:[#allocation11 + $0x78] sm:$0xff] }
  0xa1   : > { %689 = vmatpush1.msra.mxu1 %v503_v19  ;;  %619 = vmatprep.subr.mxu0 %v566_v20  ;;  %v497_v31 = vld [vmem:[#allocation9 + $0x80] sm:$0xff]  ;;  %v496_v33 = vld [vmem:[#allocation9 + $0x78] sm:$0xff]  ;;  %v559_v34 = vld [vmem:[#allocation11 + $0x70] sm:$0xff] }
  0xa2   : > { %690 = vmatprep.subr.mxu1 %v502_v21  ;;  %620 = vmatpush1.msra.mxu0 %v565_v22  ;;  %v495_v35 = vld [vmem:[#allocation9 + $0x70] sm:$0xff]  ;;  %v558_v36 = vld [vmem:[#allocation11 + $0x68] sm:$0xff]  ;;  %v557_v38 = vld [vmem:[#allocation11 + $0x60] sm:$0xff] }
  0xa3   : > { %691 = vmatpush1.msra.mxu1 %v501_v23  ;;  %621 = vmatprep.subr.mxu0 %v564_v24  ;;  %v494_v37 = vld [vmem:[#allocation9 + $0x68] sm:$0xff]  ;;  %v493_v39 = vld [vmem:[#allocation9 + $0x60] sm:$0xff]  ;;  %v556_v40 = vld [vmem:[#allocation11 + $0x58] sm:$0xff] }
  0xa4   : > { %692 = vmatprep.subr.mxu1 %v500_v25  ;;  %622 = vmatpush1.msra.mxu0 %v563_v26  ;;  %v492_v41 = vld [vmem:[#allocation9 + $0x58] sm:$0xff]  ;;  %v555_v42 = vld [vmem:[#allocation11 + $0x50] sm:$0xff]  ;;  %v554_v44 = vld [vmem:[#allocation11 + $0x48] sm:$0xff] }
  0xa5   : > { %693 = vmatpush1.msra.mxu1 %v499_v27  ;;  %623 = vmatprep.subr.mxu0 %v562_v28  ;;  %v491_v43 = vld [vmem:[#allocation9 + $0x50] sm:$0xff]  ;;  %v490_v45 = vld [vmem:[#allocation9 + $0x48] sm:$0xff]  ;;  %v553_v46 = vld [vmem:[#allocation11 + $0x40] sm:$0xff] }
  0xa6   : > { %694 = vmatprep.subr.mxu1 %v498_v29  ;;  %624 = vmatpush1.msra.mxu0 %v561_v30  ;;  %v489_v47 = vld [vmem:[#allocation9 + $0x40] sm:$0xff]  ;;  %v552_v48 = vld [vmem:[#allocation11 + $0x38] sm:$0xff]  ;;  %v551_v50 = vld [vmem:[#allocation11 + $0x30] sm:$0xff] }
  0xa7   : > { %695 = vmatpush1.msra.mxu1 %v497_v31  ;;  %625 = vmatprep.subr.mxu0 %v560_v32  ;;  %v488_v49 = vld [vmem:[#allocation9 + $0x38] sm:$0xff]  ;;  %v487_v51 = vld [vmem:[#allocation9 + $0x30] sm:$0xff]  ;;  %v550_v52 = vld [vmem:[#allocation11 + $0x28] sm:$0xff] }
  0xa8   : > { %696 = vmatprep.subr.mxu1 %v496_v33  ;;  %626 = vmatpush1.msra.mxu0 %v559_v34  ;;  %v486_v53 = vld [vmem:[#allocation9 + $0x28] sm:$0xff]  ;;  %v549_v54 = vld [vmem:[#allocation11 + $0x20] sm:$0xff]  ;;  %v548_v56 = vld [vmem:[#allocation11 + $0x18] sm:$0xff] }
  0xa9   : > { %697 = vmatpush1.msra.mxu1 %v495_v35  ;;  %627 = vmatprep.subr.mxu0 %v558_v36  ;;  %v485_v55 = vld [vmem:[#allocation9 + $0x20] sm:$0xff]  ;;  %v484_v57 = vld [vmem:[#allocation9 + $0x18] sm:$0xff]  ;;  %v547_v58 = vld [vmem:[#allocation11 + $0x10] sm:$0xff] }
  0xaa   : > { %698 = vmatprep.subr.mxu1 %v494_v37  ;;  %628 = vmatpush1.msra.mxu0 %v557_v38  ;;  %v483_v59 = vld [vmem:[#allocation9 + $0x10] sm:$0xff]  ;;  %v546_v60 = vld [vmem:[#allocation11 + $0x8] sm:$0xff]  ;;  %v545_v62 = vld [vmem:[#allocation11] sm:$0xff] }
  0xab   : > { %699 = vmatpush1.msra.mxu1 %v493_v39  ;;  %629 = vmatprep.subr.mxu0 %v556_v40  ;;  %v482_v61 = vld [vmem:[#allocation9 + $0x8] sm:$0xff]  ;;  %v481_v63 = vld [vmem:[#allocation9] sm:$0xff]  ;;  %v608_v0 = vld [vmem:[#allocation11 + $0x1f8] sm:$0xff] }
  0xac   : > { %700 = vmatprep.subr.mxu1 %v492_v41  ;;  %630 = vmatpush1.msra.mxu0 %v555_v42  ;;  %v544_v1 = vld [vmem:[#allocation9 + $0x1f8] sm:$0xff]  ;;  %v607_v2 = vld [vmem:[#allocation11 + $0x1f0] sm:$0xff]  ;;  %v606_v4 = vld [vmem:[#allocation11 + $0x1e8] sm:$0xff] }
  0xad   : > { %701 = vmatpush1.msra.mxu1 %v491_v43  ;;  %631 = vmatprep.subr.mxu0 %v554_v44  ;;  %v543_v3 = vld [vmem:[#allocation9 + $0x1f0] sm:$0xff]  ;;  %v542_v5 = vld [vmem:[#allocation9 + $0x1e8] sm:$0xff]  ;;  %v605_v6 = vld [vmem:[#allocation11 + $0x1e0] sm:$0xff] }
  0xae   : > { %702 = vmatprep.subr.mxu1 %v490_v45  ;;  %632 = vmatpush1.msra.mxu0 %v553_v46  ;;  %v541_v7 = vld [vmem:[#allocation9 + $0x1e0] sm:$0xff]  ;;  %v604_v8 = vld [vmem:[#allocation11 + $0x1d8] sm:$0xff]  ;;  %v603_v10 = vld [vmem:[#allocation11 + $0x1d0] sm:$0xff] }
  0xaf   : > { %703 = vmatpush1.msra.mxu1 %v489_v47  ;;  %633 = vmatprep.subr.mxu0 %v552_v48  ;;  %v540_v9 = vld [vmem:[#allocation9 + $0x1d8] sm:$0xff]  ;;  %v539_v11 = vld [vmem:[#allocation9 + $0x1d0] sm:$0xff]  ;;  %v602_v12 = vld [vmem:[#allocation11 + $0x1c8] sm:$0xff] }
  0xb0   : > { %704 = vmatprep.subr.mxu1 %v488_v49  ;;  %634 = vmatpush1.msra.mxu0 %v551_v50  ;;  %v538_v13 = vld [vmem:[#allocation9 + $0x1c8] sm:$0xff]  ;;  %v601_v14 = vld [vmem:[#allocation11 + $0x1c0] sm:$0xff]  ;;  %v600_v16 = vld [vmem:[#allocation11 + $0x1b8] sm:$0xff] }
  0xb1   : > { %705 = vmatpush1.msra.mxu1 %v487_v51  ;;  %635 = vmatprep.subr.mxu0 %v550_v52  ;;  %v537_v15 = vld [vmem:[#allocation9 + $0x1c0] sm:$0xff]  ;;  %v536_v17 = vld [vmem:[#allocation9 + $0x1b8] sm:$0xff]  ;;  %v599_v18 = vld [vmem:[#allocation11 + $0x1b0] sm:$0xff] }
  0xb2   : > { %706 = vmatprep.subr.mxu1 %v486_v53  ;;  %636 = vmatpush1.msra.mxu0 %v549_v54  ;;  %v535_v19 = vld [vmem:[#allocation9 + $0x1b0] sm:$0xff]  ;;  %v598_v20 = vld [vmem:[#allocation11 + $0x1a8] sm:$0xff]  ;;  %v597_v22 = vld [vmem:[#allocation11 + $0x1a0] sm:$0xff] }
  0xb3   : > { %707 = vmatpush1.msra.mxu1 %v485_v55  ;;  %637 = vmatprep.subr.mxu0 %v548_v56  ;;  %v534_v21 = vld [vmem:[#allocation9 + $0x1a8] sm:$0xff]  ;;  %v533_v23 = vld [vmem:[#allocation9 + $0x1a0] sm:$0xff]  ;;  %v596_v24 = vld [vmem:[#allocation11 + $0x198] sm:$0xff] }
  0xb4   : > { %708 = vmatprep.subr.mxu1 %v484_v57  ;;  %638 = vmatpush1.msra.mxu0 %v547_v58  ;;  %v532_v25 = vld [vmem:[#allocation9 + $0x198] sm:$0xff]  ;;  %v595_v26 = vld [vmem:[#allocation11 + $0x190] sm:$0xff]  ;;  %v594_v28 = vld [vmem:[#allocation11 + $0x188] sm:$0xff] }
  0xb5   : > { %709 = vmatpush1.msra.mxu1 %v483_v59  ;;  %639 = vmatprep.subr.mxu0 %v546_v60  ;;  %v531_v27 = vld [vmem:[#allocation9 + $0x190] sm:$0xff]  ;;  %v530_v29 = vld [vmem:[#allocation9 + $0x188] sm:$0xff]  ;;  %v434_v31 = vld [vmem:[%s1657_s21 + $0x18] sm:$0xff] }
  0xb6   : > { %710 = vmatprep.subr.mxu1 %v482_v61  ;;  %640 = vmatpush1.msra.mxu0 %v545_v62  ;;  %v432_v30 = vld [vmem:[%s1657_s21 + $0x8] sm:$0xff]  ;;  %v593_v32 = vld [vmem:[#allocation11 + $0x180] sm:$0xff]  ;;  %v438_v35 = vld [vmem:[%s1665_s3 + $0x18] sm:$0xff] }
  0xb7   : > { %711 = vmatpush1.msra.mxu1 %v481_v63  ;;  %641 = vmatprep.subr.mxu0 %v608_v0  ;;  %v529_v33 = vld [vmem:[#allocation9 + $0x180] sm:$0xff]  ;;  %v436_v34 = vld [vmem:[%s1665_s3 + $0x8] sm:$0xff]  ;;  %v592_v37 = vld [vmem:[#allocation11 + $0x178] sm:$0xff]  ;;  %v442_v39 = vadd.f32 %v438_v35, %v434_v31 }
  0xb8   : > { %712 = vmatprep.subr.mxu1 %v544_v1  ;;  %642 = vmatpush2.msra.mxu0 %v607_v2  ;;  %v444_v36 = vld [vmem:[%s1672_s28 + $0x8] sm:$0xff]  ;;  %v440_v38 = vadd.f32 %v436_v34, %v432_v30  ;;  %v446_v40 = vld [vmem:[%s1672_s28 + $0x18] sm:$0xff]  ;;  %v431_v41 = vld [vmem:[%s1657_s21] sm:$0xff] }
  0xb9   : > { %713 = vmatpush2.msra.mxu1 %v543_v3  ;;  %643 = vmatprep.subr.mxu0 %v606_v4  ;;  %v433_v42 = vld [vmem:[%s1657_s21 + $0x10] sm:$0xff]  ;;  %v435_v43 = vld [vmem:[%s1665_s3] sm:$0xff]  ;;  %v528_v45 = vld [vmem:[#allocation9 + $0x178] sm:$0xff]  ;;  %v1690_v47 = vadd.f32 %v446_v40, %v442_v39 }
  0xba   : > { %714 = vmatprep.subr.mxu1 %v542_v5  ;;  %644 = vmatpush2.msra.mxu0 %v605_v6  ;;  %v437_v44 = vld [vmem:[%s1665_s3 + $0x10] sm:$0xff]  ;;  %v1688_v46 = vadd.f32 %v444_v36, %v440_v38  ;;  %v439_v48 = vadd.f32 %v435_v43, %v431_v41  ;;  %v443_v49 = vld [vmem:[%s1672_s28] sm:$0xff]  ;;  %v590_v54 = vld [vmem:[#allocation11 + $0x168] sm:$0xff]  ;;  %s1300_s3 = sshll.u32 %s1379_s16, 4  ;;  %s1301_s3 = int_to_ptr.vmem [resolvable:$false] %s1300_s3 }
  0xbb   : > { %715 = vmatpush2.msra.mxu1 %v541_v7  ;;  %645 = vmatprep.subr.mxu0 %v604_v8  ;;  %v445_v50 = vld [vmem:[%s1672_s28 + $0x10] sm:$0xff]  ;;  %v441_v53 = vadd.f32 %v437_v44, %v433_v42  ;;  %v526_v55 = vld [vmem:[#allocation9 + $0x168] sm:$0xff]  ;;  %v589_v59 = vld [vmem:[#allocation11 + $0x160] sm:$0xff]  ;;  %s1302_s28 = scalar_lea.vmem %s1301_s3, 1024  ;;  %p1303_p9 = scmp.lt.s32.totalorder %s1724_s4, %s1301_s3 }
  0xbc   : > { %716 = vmatprep.subr.mxu1 %v540_v9  ;;  %646 = vmatpush2.msra.mxu0 %v603_v10  ;;  %v591_v51 = vld [vmem:[#allocation11 + $0x170] sm:$0xff]  ;;  %v474_v56 = vmax.f32 %v1688_v46, %v1690_v47  ;;  %v458_v57 = vadd.f32 %v1690_v47, %v1688_v46  ;;  %v1698_v58 = vadd.f32 %v443_v49, %v439_v48  ;;  %v525_v60 = vld [vmem:[#allocation9 + $0x160] sm:$0xff]  ;;  %v588_v62 = vld [vmem:[#allocation11 + $0x158] sm:$0xff]  ;;  %p1304_p10 = scmp.lt.s32.totalorder %s1302_s28, %s1296_s15 }
  0xbd   : > { %717 = vmatpush2.msra.mxu1 %v539_v11  ;;  %647 = vmatprep.subr.mxu0 %v602_v12  ;;  %v527_v52 = vld [vmem:[#allocation9 + $0x170] sm:$0xff]  ;;  %v1700_v61 = vadd.f32 %v445_v50, %v441_v53  ;;  %v524_v63 = vld [vmem:[#allocation9 + $0x158] sm:$0xff]  ;;  %v586_v6 = vld [vmem:[#allocation11 + $0x148] sm:$0xff] }
  0xbe   : > { %718 = vmatprep.subr.mxu1 %v538_v13  ;;  %648 = vmatpush2.msra.mxu0 %v601_v14  ;;  %v475_v0 = vrot.slane %v474_v56, 4  ;;  %v459_v1 = vrot.slane %v458_v57, 4  ;;  %v587_v2 = vld [vmem:[#allocation11 + $0x150] sm:$0xff]  ;;  %v522_v7 = vld [vmem:[#allocation9 + $0x148] sm:$0xff]  ;;  %v585_v10 = vld [vmem:[#allocation11 + $0x140] sm:$0xff]  ;;  %p1305_p1 = por %p1304_p10, %p1303_p9 }
  0xbf   : > { %719 = vmatpush2.msra.mxu1 %v537_v15  ;;  %649 = vmatprep.subr.mxu0 %v600_v16  ;;  %v523_v3 = vld [vmem:[#allocation9 + $0x150] sm:$0xff]  ;;  %v467_v4 = vmax.f32 %v1698_v58, %v1700_v61  ;;  %v451_v5 = vadd.f32 %v1700_v61, %v1698_v58  ;;  %v521_v11 = vld [vmem:[#allocation9 + $0x140] sm:$0xff]  ;;  %v584_v14 = vld [vmem:[#allocation11 + $0x138] sm:$0xff] }
  0xc0   : > { %720 = vmatprep.subr.mxu1 %v536_v17  ;;  %650 = vmatpush2.msra.mxu0 %v599_v18  ;;  %v476_v8 = vmax.f32 %v474_v56, %v475_v0  ;;  %v460_v9 = vadd.f32 %v459_v1, %v458_v57  ;;  %v520_v15 = vld [vmem:[#allocation9 + $0x138] sm:$0xff]  ;;  %v583_v18 = vld [vmem:[#allocation11 + $0x130] sm:$0xff]  ;;  %v578_v38 = vld [vmem:[#allocation11 + $0x108] sm:$0xff]  ;;  %p1306_p5 = pnand %p1305_p1, %p1299_p7 }
  0xc1   : > { %721 = vmatpush2.msra.mxu1 %v535_v19  ;;  %651 = vmatprep.subr.mxu0 %v598_v20  ;;  %v468_v12 = vrot.slane %v467_v4, 4  ;;  %v452_v13 = vrot.slane %v451_v5, 4  ;;  %v519_v19 = vld [vmem:[#allocation9 + $0x130] sm:$0xff]  ;;  %v580_v30 = vld [vmem:[#allocation11 + $0x118] sm:$0xff]  ;;  %v514_v39 = vld [vmem:[#allocation9 + $0x108] sm:$0xff] }
  0xc2   : > { %722 = vmatprep.subr.mxu1 %v534_v21  ;;  %652 = vmatpush2.msra.mxu0 %v597_v22  ;;  %v477_v16 = vrot.slane %v476_v8, 2  ;;  %v461_v17 = vrot.slane %v460_v9, 2  ;;  %v582_v22 = vld [vmem:[#allocation11 + $0x128] sm:$0xff]  ;;  %v516_v31 = vld [vmem:[#allocation9 + $0x118] sm:$0xff]  ;;  %v579_v34 = vld [vmem:[#allocation11 + $0x110] sm:$0xff] }
  0xc3   : > { %723 = vmatpush2.msra.mxu1 %v533_v23  ;;  %653 = vmatprep.subr.mxu0 %v596_v24  ;;  %v469_v20 = vmax.f32 %v467_v4, %v468_v12  ;;  %v453_v21 = vadd.f32 %v452_v13, %v451_v5  ;;  %v518_v23 = vld [vmem:[#allocation9 + $0x128] sm:$0xff]  ;;  %v515_v35 = vld [vmem:[#allocation9 + $0x110] sm:$0xff]  ;;  %v577_v42 = vld [vmem:[#allocation11 + $0x100] sm:$0xff] }
  0xc4   : > { %724 = vmatprep.subr.mxu1 %v532_v25  ;;  %654 = vmatpush2.msra.mxu0 %v595_v26  ;;  %v478_v24 = vmax.f32 %v476_v8, %v477_v16  ;;  %v462_v25 = vadd.f32 %v461_v17, %v460_v9  ;;  %v581_v26 = vld [vmem:[#allocation11 + $0x120] sm:$0xff]  ;;  %v767_v9 = vlaneseq }
  0xc5   : > { %725 = vmatpush2.msra.mxu1 %v531_v27  ;;  %655 = vmatprep.subr.mxu0 %v594_v28  ;;  %v517_v27 = vld [vmem:[#allocation9 + $0x120] sm:$0xff]  ;;  %v470_v28 = vrot.slane %v469_v20, 2 }
  0xc6   : > { %726 = vmatprep.subr.mxu1 %v530_v29  ;;  %656 = vmatpush2.msra.mxu0 %v593_v32  ;;  %v454_v29 = vrot.slane %v453_v21, 2  ;;  %v479_v32 = vrot.slane %v478_v24, 1  ;;  %v781_v53 = vld [vmem:[%s1779_s7] sm:$0xff] }
  0xc7   : > { %727 = vmatpush2.msra.mxu1 %v529_v33  ;;  %657 = vmatprep.subr.mxu0 %v592_v37  ;;  %v463_v33 = vrot.slane %v462_v25, 1  ;;  %v471_v36 = vmax.f32 %v469_v20, %v470_v28  ;;  %v779_v20 = vld [vmem:[%s1778_s6] sm:$0xff] }
  0xc8   : > { %728 = vmatprep.subr.mxu1 %v528_v45  ;;  %658 = vmatpush2.msra.mxu0 %v591_v51  ;;  %v455_v37 = vadd.f32 %v454_v29, %v453_v21  ;;  %v480_v40 = vmax.f32 %v478_v24, %v479_v32  ;;  %v513_v45 = vld [vmem:[#allocation9 + $0x100] sm:$0xff] }
  0xc9   : > { %729 = vmatpush2.msra.mxu1 %v527_v52  ;;  %659 = vmatprep.subr.mxu0 %v590_v54  ;;  %v464_v41 = vadd.f32 %v463_v33, %v462_v25  ;;  %v472_v43 = vrot.slane %v471_v36, 1  ;;  %v1377_v52 = vmov 0.0   ;;  %v1378_v54 = vmov 0  }
  0xca   : > { %730 = vmatprep.subr.mxu1 %v526_v55  ;;  %660 = vmatpush2.msra.mxu0 %v589_v59  ;;  %v456_v44 = vrot.slane %v455_v37, 1  ;;  %v782_v55 = vld [vmem:[%s1779_s7 + $0x8] sm:$0xff]  ;;  %v752_v59 = vstv %s751_s11 }
  0xcb   : > { %731 = vmatpush2.msra.mxu1 %v525_v60  ;;  %661 = vmatprep.subr.mxu0 %v588_v62  ;;  %v466_v48 = vmul.f32 0.0625, %v464_v41  ;;  %v473_v49 = vmax.f32 %v471_v36, %v472_v43 }
  0xcc   : > { %732 = vmatprep.subr.mxu1 %v524_v63  ;;  %662 = vmatpush2.msra.mxu0 %v587_v2  ;;  %v457_v50 = vadd.f32 %v456_v44, %v455_v37 }
  0xcd   : > { %733 = vmatpush2.msra.mxu1 %v523_v3  ;;  %663 = vmatprep.subr.mxu0 %v586_v6 }
  0xce   : > { %734 = vmatprep.subr.mxu1 %v522_v7  ;;  %664 = vmatpush2.msra.mxu0 %v585_v10  ;;  %v465_v51 = vmul.f32 0.0625, %v457_v50  ;;  %v768_v10 = vshrl.u32 %v767_v9, 7 }
  0xcf   : > { %735 = vmatpush2.msra.mxu1 %v521_v11  ;;  %665 = vmatprep.subr.mxu0 %v584_v14 }
  0xd0   : > { %736 = vmatprep.subr.mxu1 %v520_v15  ;;  %666 = vmatpush2.msra.mxu0 %v583_v18  ;;  %v769_v11 = vsub.s32 0, %v768_v10 }
  0xd1   : > { %737 = vmatpush2.msra.mxu1 %v519_v19  ;;  %667 = vmatprep.subr.mxu0 %v582_v22 }
  0xd2   : > { %738 = vmatprep.subr.mxu1 %v518_v23  ;;  %668 = vmatpush2.msra.mxu0 %v581_v26 }
  0xd3   : > { %739 = vmatpush2.msra.mxu1 %v517_v27  ;;  %669 = vmatprep.subr.mxu0 %v580_v30 }
  0xd4   : > { %740 = vmatprep.subr.mxu1 %v516_v31  ;;  %670 = vmatpush2.msra.mxu0 %v579_v34 }
  0xd5   : > { %741 = vmatpush2.msra.mxu1 %v515_v35  ;;  %671 = vmatprep.subr.mxu0 %v578_v38 }
  0xd6   : > { %742 = vmatprep.subr.mxu1 %v514_v39  ;;  %672 = vmatpush2.msra.mxu0 %v577_v42 }
  0xd7   : > { %673 = vmatprep.mubr.f32.mxu0 %v480_v40  ;;  %743 = vmatpush2.msra.mxu1 %v513_v45 }
  0xd8   : > { %744 = vmatprep.mubr.f32.mxu1 %v466_v48  ;;  %674 = vmatmul.mubr.f32.vlgmr.msra.gmra.mxu0 %v473_v49 }
  0xd9   : > { %745 = vmatmul.mubr.f32.vlgmr.msra.gmra.mxu1 %v465_v51  ;;  %864 = vmatprep.mubr.f32.mxu0 %v1377_v52 }
  0xda   : > { %870 = vmatprep.mubr.f32.mxu1 %v1377_v52  ;;  %1151 = vset.pattern.permute.xlu0 %v1378_v54 }
  0xdb   : > { %785 = vperm.xlu0 %1151, %v781_v53  }
  0xdf   : > { %790 = vperm.xlu0 %1151, %v782_v55  }
 0x198   : > { %v675_v56 = vpop.f32.mrf.mxu0 }
 0x199   : > { %v746_v57 = vpop.f32.mrf.mxu1 }
 0x19a   : > { %v747_v60 = vadd.f32 %v746_v57, %v675_v56  ;;  %v677_v62 = vpop.f32.mrf.mxu0 }
 0x19b   : > { %v748_v63 = vpop.f32.mrf.mxu1 }
 0x19c   : > { %v753_v0 = vadd.f32 %v752_v59, %v747_v60  ;;  %v749_v1 = vadd.f32 %v748_v63, %v677_v62 }
 0x19e   : > { %v1051_v2 = vmul.f32 -1.442695, %v753_v0  ;;  %v754_v3 = vadd.f32 %v752_v59, %v749_v1 }
 0x1a0   : > { %1152 = vpow2.f32 %v1051_v2  ;;  %v1052_v4 = vmul.f32 -1.442695, %v754_v3 }
 0x1a2   : > { %1154 = vpow2.f32 %v1052_v4 }
 0x1ad   : > { %v1153_v5 = vpop.eup %1152 }
 0x1ae   : > { %v761_v6 = vadd.f32 1.0, %v1153_v5 }
 0x1af   : > { %v1155_v7 = vpop.eup %1154 }
 0x1b0   : > { %1156 = vrcp.f32 %v761_v6  ;;  %v762_v8 = vadd.f32 1.0, %v1155_v7 }
 0x1b2   : > { %1158 = vrcp.f32 %v762_v8 }
 0x1bd   : > { %v1157_v12 = vpop.eup %1156 }
 0x1be   : > { %v770_v14 = vrot.slane %v1157_v12, %v769_v11 }
 0x1bf   : > { %v1159_v13 = vpop.eup %1158 }
 0x1c0   : > { %v774_v15 = vrot.slane %v1159_v13, %v769_v11  ;;  %v777_v17 = vmul.f32 %v770_v14, %v1700_v61  ;;  %v775_v19 = vmul.f32 %v770_v14, %v1698_v58 }
 0x1c2   : > { %v778_v16 = vmul.f32 %v774_v15, %v1690_v47  ;;  %v776_v18 = vmul.f32 %v774_v15, %v1688_v46  ;;  %v780_v47 = vld [vmem:[%s1778_s6 + $0x8] sm:$0xff]  ;;  %v786_v46 = vpop.permute.xlu0 %785 }
 0x1c4   : > { %828 = vmatprep.subr.mxu0 %v778_v16  ;;  %1064 = vmatprep.subr.mxu1 %v778_v16 }
 0x1c5   : > { %829 = vmatpush1.msra.mxu0 %v777_v17  ;;  %1066 = vmatpush1.msra.mxu1 %v777_v17 }
 0x1c6   : > { %830 = vmatprep.subr.mxu0 %v776_v18  ;;  %1065 = vmatprep.subr.mxu1 %v776_v18  ;;  %v791_v61 = vpop.permute.xlu0 %790 }
 0x1c7   : > { %831 = vmatpush1.msra.mxu0 %v775_v19  ;;  %1067 = vmatpush1.msra.mxu1 %v775_v19 }
 0x1c8   : > { %1053 = vmatmul.mubr.msk.f32.vlgmr.msra.gmra.mxu0 %vm793_vm0, %v779_v20  ;;  %1054 = vmatmul.mubr.msk.f32.vlgmr.msra.gmra.mxu1 %vm793_vm0, %v780_v47 }
 0x288   : > { %v866_v58 = vpop.f32.mrf.mxu0  ;;  %v872_v21 = vpop.f32.mrf.mxu1 }
 0x289   : > { %v867_v22 = vadd.f32 %v866_v58, %v786_v46  ;;  %v873_v23 = vadd.f32 %v872_v21, %v791_v61 }
 0x28a   : > { %v868_v24 = vpop.f32.mrf.mxu0  ;;  %v874_v25 = vpop.f32.mrf.mxu1 }
 0x28b   : > { %877 = vst [vmem:[%s430_s14] sm:$0xff] %v867_v22  ;;  %879 = vst [vmem:[%s430_s14 + $0x10] sm:$0xff] %v873_v23  ;;  %v869_v26 = vadd.f32 %v868_v24, %v786_v46  ;;  %v875_v27 = vadd.f32 %v874_v25, %v791_v61 }
 0x28d   : > { %878 = vst [vmem:[%s430_s14 + $0x8] sm:$0xff] %v869_v26  ;;  %880 = vst [vmem:[%s430_s14 + $0x18] sm:$0xff] %v875_v27 }
 0x28e   : > { %1309 = shalt.err (!%p1306_p5)
}
 0x28f   : > { %s1310_s17 = scalar_lea.hbm %s1729_s20, 512  ;;  %s1314_s22 = scalar_lea.hbm %s1780_s8, 1024 }
 0x290   : > { %p1311_p12 = scmp.ne.s32.totalorder %s1729_s20, %s1310_s17  ;;  %p1315_p3 = scmp.lt.s32.totalorder %s1729_s20, %s1780_s8 }
 0x291   : > { %p1316_p4 = scmp.lt.s32.totalorder %s1314_s22, %s1310_s17 }
 0x292   : > { %p1312_p0 = pnand %p1311_p12, %p1822_p13 }
 0x293   : > { %p1317_p8 = por %p1316_p4, %p1315_p3 }
 0x294   : > { %p1313_p11 = pneg %p1312_p0 }
 0x296   : > { %p1318_p6 = pnand %p1317_p8, %p1313_p11 }
 0x298   : > { %1321 = shalt.err (!%p1318_p6)
}
 0x299   : > { %s1380_s24 = smov 256   ;;  %s1381_s13 = smov 16  }
 0x29a   : > { %1082 = dma.vmem_to_hbm [thread:$0]  (%p1822_p13), %s1724_s4, 512, %s1729_s20, %s882_s5, %s1380_s24, %s1380_s24, %s1381_s13  }
 0x29b PF: > { %s1823_s25 = sld [smem:[#allocation17_spill]]  ;;  %s910_s14 = sand.u32 1, %s1356_s29  }
 0x29c   : > { %p1824_p2 = scmp.ne.s32.totalorder %s1805_s19, 0  ;;  %s911_s12 = scalar_lea.sflag [#allocation5], %s910_s14 }
 0x2a1   : > { %p1825_p7 = scmp.ge.s32.totalorder %s1823_s25, 2 }
 0x2a3   : > { %p1102_p9 = pnand %p1825_p7, %p1824_p2 }
 0x2a5   : > { %p1103_p10 = pneg %p1102_p9 }
 0x2a7   : > { %1351 = dma.done.wait (%p1103_p10), %s911_s12, 512  }
 0x2a8   : > { %1353 = vsyncadd (%p1103_p10), %s911_s12, 4294966784  ;;  %s1826_s10 = sld [smem:[#allocation18_spill]]  ;;  %s1828_s29 = smov %s1360_s30 }
 0x2a9   : > { %s1827_s21 = sld [smem:[#allocation19_spill]]  ;;  %s1829_s30 = smov %s1364_s9 }
 0x2ae   : > { %p26_p1 = scmp.ge.s32.totalorder %s1826_s10, 4  }
 0x2af   : > { %s1830_s9 = smov %s1827_s21 }
 0x2b0   :  { %28 = sbr.rel (!%p26_p1) target bundleno = 13 (0xd), region = 129 }
 0x2b5   :  { %916 = vsyncpa [#allocation4], 1 }
 0x2b6   :  { %918 = vsyncpa [#allocation4 + $0x1], 1 }
 0x2b7   :  { %919 = vsyncpa [#allocation7], 1 }
 0x2b8   :  { %921 = vsyncpa [#allocation7 + $0x1], 1 }
 0x2b9   :  { %922 = vsyncpa [#allocation10], 1 }
 0x2ba   :  { %923 = vsyncpa [#allocation5], 1 }
 0x2bb   :  { %925 = vsyncpa [#allocation5 + $0x1], 1 }

</bundles_post_ra>
